<compile_context>
chip_gen: v7x
topology: tpu7x:2x2x1
jax: 0.10.0
libtpu: 0.0.40
codegen_flags: <defaults>
</compile_context>

<pallas_src>
import jax
import jax.numpy as jnp
from jax.experimental import pallas as pl
from jax.experimental.pallas import tpu as pltpu


def _mg_quad_kernel(mu_ref, dcovinv_ref, r_ref, postcov_ref, out_ref,
                    v_acc, t_acc):
    # mu_ref:      (1, ti)   chunk i of mu.T
    # dcovinv_ref: (ti, tj)  tile (i, j) of d_cov_inv
    # r_ref:       (tj, M)   row-chunk j of R
    # postcov_ref: (M, M)    full post_cov (constant block -> fetched once)
    # out_ref:     (1, 1)    a = temp @ post_cov.T @ temp.T
    # v_acc:       (1, tj)   VMEM scratch: partial of (mu.T @ d_cov_inv)[:, j]
    # t_acc:       (1, M)    VMEM scratch: accumulated temp = mu.T@d_cov_inv@R
    j = pl.program_id(0)
    i = pl.program_id(1)
    nj = pl.num_programs(0)
    ni = pl.num_programs(1)

    @pl.when(jnp.logical_and(j == 0, i == 0))
    def _():
        t_acc[...] = jnp.zeros_like(t_acc)

    @pl.when(i == 0)
    def _():
        v_acc[...] = jnp.zeros_like(v_acc)

    # Accumulate v_j = mu.T @ d_cov_inv[:, j-block] over row chunks i.
    v_acc[...] += jnp.dot(mu_ref[...], dcovinv_ref[...],
                          preferred_element_type=jnp.float32)

    @pl.when(i == ni - 1)
    def _():
        # temp += v_j @ R[j-block, :]
        t_acc[...] += jnp.dot(v_acc[...], r_ref[...],
                              preferred_element_type=jnp.float32)

    @pl.when(jnp.logical_and(j == nj - 1, i == ni - 1))
    def _():
        temp = t_acc[...]                                  # (1, M)
        tcol = temp.T                                      # (M, 1) tiny relayout
        # temp @ post_cov.T @ temp.T == sum((post_cov @ temp.T) * temp.T)
        w = jnp.dot(postcov_ref[...], tcol,
                    preferred_element_type=jnp.float32)    # (M, 1)
        out_ref[...] = jnp.sum(w * tcol).reshape(1, 1)


def _chunk(n, preferred=512, align=128):
    """Largest multiple of `align` that divides n and is <= preferred.

    Falls back to n itself (single full block) so shapes stay legal
    (block dims must be (8,128)-aligned or equal the full array dim).
    """
    if n <= preferred:
        return n
    best = None
    c = align
    while c <= preferred:
        if n % c == 0:
            best = c
        c += align
    return best if best is not None else n


def _logdet(x):
    sign, logabs = jnp.linalg.slogdet(x)
    # torch.logdet returns NaN for non-positive determinants
    return jnp.where(sign > 0, logabs, jnp.nan).astype(jnp.float32)


def mg_loss(d, d_cov_inv, R, post_cov, f_cov, eps=1e-6):
    """JAX/Pallas equivalent of MGLoss.forward(model)."""
    del eps  # eps is unused in the PyTorch forward
    N = d.shape[0]
    M = R.shape[1]

    mu_t = d.reshape(1, N).astype(jnp.float32)               # mu.T
    d_cov_inv = d_cov_inv.astype(jnp.float32)
    R = R.astype(jnp.float32)
    post_cov = post_cov.astype(jnp.float32)

    ti = _chunk(N)   # row-chunk of d_cov_inv (contraction with mu)
    tj = _chunk(N)   # column-chunk of d_cov_inv == row-chunk of R
    ni = N // ti
    nj = N // tj

    a = pl.pallas_call(
        _mg_quad_kernel,
        out_shape=jax.ShapeDtypeStruct((1, 1), jnp.float32),
        grid=(nj, ni),                                        # i innermost
        in_specs=[
            pl.BlockSpec((1, ti), lambda j, i: (0, i)),       # mu.T chunk
            pl.BlockSpec((ti, tj), lambda j, i: (i, j)),      # d_cov_inv tile
            pl.BlockSpec((tj, M), lambda j, i: (j, 0)),       # R row-chunk
            pl.BlockSpec((M, M), lambda j, i: (0, 0)),        # post_cov (once)
        ],
        out_specs=pl.BlockSpec((1, 1), lambda j, i: (0, 0)),
        scratch_shapes=[
            pltpu.VMEM((1, tj), jnp.float32),                 # v_acc
            pltpu.VMEM((1, M), jnp.float32),                  # t_acc
        ],
        compiler_params=pltpu.CompilerParams(
            dimension_semantics=("arbitrary", "arbitrary")),
    )(mu_t, d_cov_inv, R, post_cov)

    # logdet terms + scalar combine in plain JAX (kernel outputs only `a`).
    b = _logdet(post_cov)
    c = _logdet(f_cov)
    return -(b - c + a)                                       # (1, 1)


def _make_spd(key, n):
    a = jax.random.normal(key, (n, n), dtype=jnp.float32)
    return a @ a.T + n * jnp.eye(n, dtype=jnp.float32)


if __name__ == "__main__":
    # Deterministic synthetic "model" attributes (small shapes).
    N, M = 32, 16
    key = jax.random.PRNGKey(0)
    k_d, k_dc, k_r, k_pc, k_fc = jax.random.split(key, 5)

    d = jax.random.normal(k_d, (N,), dtype=jnp.float32)          # model.d
    d_cov = _make_spd(k_dc, N)
    d_cov_inv = jnp.linalg.inv(d_cov)                            # model.d_cov_inv
    R = jax.random.normal(k_r, (N, M), dtype=jnp.float32)        # model.R
    post_cov = _make_spd(k_pc, M)                                # model.post_cov
    f_cov = _make_spd(k_fc, N)                                   # model.f_cov

    loss = mg_loss(d, d_cov_inv, R, post_cov, f_cov)
    jax.block_until_ready(loss)

    # Pure-JAX reference check.
    mu_t = d.reshape(1, N)
    temp = mu_t @ d_cov_inv @ R
    a_ref = temp @ post_cov.T @ temp.T
    b_ref = _logdet(post_cov)
    c_ref = _logdet(f_cov)
    loss_ref = -(b_ref - c_ref + a_ref)
    assert loss.shape == (1, 1)
    assert jnp.allclose(loss, loss_ref, rtol=1e-4, atol=1e-4), (loss, loss_ref)

    print("KERNEL_OK")
</pallas_src>

<mosaic_0001>
module attributes {stable_mosaic.version = 11 : i64} {
  func.func @_mg_quad_kernel(%arg0: i32, %arg1: i32, %arg2: memref<1x32xf32, #tpu.memory_space<vmem>>, %arg3: memref<32x32xf32, #tpu.memory_space<vmem>>, %arg4: memref<32x16xf32, #tpu.memory_space<vmem>>, %arg5: memref<16x16xf32, #tpu.memory_space<vmem>>, %arg6: memref<1x1xf32, #tpu.memory_space<vmem>>, %arg7: memref<1x32xf32, #tpu.memory_space<vmem>>, %arg8: memref<1x16xf32, #tpu.memory_space<vmem>>) attributes {dimension_semantics = [#tpu.dimension_semantics<arbitrary>, #tpu.dimension_semantics<arbitrary>], iteration_bounds = array<i64: 1, 1>, scalar_prefetch = 0 : i64, scratch_operands = 2 : i64, tpu.core_type = #tpu.core_type<tc>, window_params = [{transform_indices = @transform_0, window_bounds = array<i64: 1, 32>}, {transform_indices = @transform_1, window_bounds = array<i64: 32, 32>}, {transform_indices = @transform_2, window_bounds = array<i64: 32, 16>}, {pipeline_mode = #tpu.pipeline_mode<synchronous>, transform_indices = @transform_3, window_bounds = array<i64: 16, 16>}, {pipeline_mode = #tpu.pipeline_mode<synchronous>, transform_indices = @transform_4, window_bounds = array<i64: 1, 1>}]} {
    %c0_i32 = arith.constant 0 : i32
    %0 = arith.cmpi eq, %arg0, %c0_i32 : i32
    %c0_i32_0 = arith.constant 0 : i32
    %1 = arith.cmpi eq, %arg1, %c0_i32_0 : i32
    %2 = arith.andi %0, %1 : i1
    %3 = arith.extui %2 : i1 to i32
    %c0_i32_1 = arith.constant 0 : i32
    %4 = arith.cmpi ne, %3, %c0_i32_1 : i32
    scf.if %4 {
      %cst_16 = arith.constant 0.000000e+00 : f32
      %22 = vector.broadcast %cst_16 : f32 to vector<1x16xf32>
      %c0_17 = arith.constant 0 : index
      %c0_18 = arith.constant 0 : index
      %23 = vector.load %arg8[%c0_17, %c0_18] : memref<1x16xf32, #tpu.memory_space<vmem>>, vector<1x16xf32>
      tpu.vector_store %arg8[%c0_17, %c0_18], %22 {strides = array<i32>} : memref<1x16xf32, #tpu.memory_space<vmem>>, vector<1x16xf32>,
    } else {
    }
    %c0_i32_2 = arith.constant 0 : i32
    %5 = arith.cmpi eq, %arg1, %c0_i32_2 : i32
    %6 = arith.extui %5 : i1 to i32
    %c0_i32_3 = arith.constant 0 : i32
    %7 = arith.cmpi ne, %6, %c0_i32_3 : i32
    scf.if %7 {
      %cst_16 = arith.constant 0.000000e+00 : f32
      %22 = vector.broadcast %cst_16 : f32 to vector<1x32xf32>
      %c0_17 = arith.constant 0 : index
      %c0_18 = arith.constant 0 : index
      %23 = vector.load %arg7[%c0_17, %c0_18] : memref<1x32xf32, #tpu.memory_space<vmem>>, vector<1x32xf32>
      tpu.vector_store %arg7[%c0_17, %c0_18], %22 {strides = array<i32>} : memref<1x32xf32, #tpu.memory_space<vmem>>, vector<1x32xf32>,
    } else {
    }
    %c0 = arith.constant 0 : index
    %c0_4 = arith.constant 0 : index
    %8 = vector.load %arg7[%c0, %c0_4] : memref<1x32xf32, #tpu.memory_space<vmem>>, vector<1x32xf32>
    %c0_5 = arith.constant 0 : index
    %c0_6 = arith.constant 0 : index
    %9 = vector.load %arg2[%c0_5, %c0_6] : memref<1x32xf32, #tpu.memory_space<vmem>>, vector<1x32xf32>
    %c0_7 = arith.constant 0 : index
    %c0_8 = arith.constant 0 : index
    %10 = vector.load %arg3[%c0_7, %c0_8] : memref<32x32xf32, #tpu.memory_space<vmem>>, vector<32x32xf32>
    %cst = arith.constant dense<0.000000e+00> : vector<1x32xf32>
    %11 = tpu.matmul %9, %10, %cst {dimension_numbers = #tpu.dot_dimension_numbers<[1], [0], [0], [1], [0, 0, 1, 1], [], []>} : vector<1x32xf32>, vector<32x32xf32>, vector<1x32xf32> -> vector<1x32xf32>
    %12 = arith.addf %8, %11 : vector<1x32xf32>
    %c0_9 = arith.constant 0 : index
    %c0_10 = arith.constant 0 : index
    %13 = vector.load %arg7[%c0_9, %c0_10] : memref<1x32xf32, #tpu.memory_space<vmem>>, vector<1x32xf32>
    tpu.vector_store %arg7[%c0_9, %c0_10], %12 {strides = array<i32>} : memref<1x32xf32, #tpu.memory_space<vmem>>, vector<1x32xf32>,
    %c0_i32_11 = arith.constant 0 : i32
    %14 = arith.cmpi eq, %arg1, %c0_i32_11 : i32
    %15 = arith.extui %14 : i1 to i32
    %c0_i32_12 = arith.constant 0 : i32
    %16 = arith.cmpi ne, %15, %c0_i32_12 : i32
    scf.if %16 {
      %c0_16 = arith.constant 0 : index
      %c0_17 = arith.constant 0 : index
      %22 = vector.load %arg8[%c0_16, %c0_17] : memref<1x16xf32, #tpu.memory_space<vmem>>, vector<1x16xf32>
      %c0_18 = arith.constant 0 : index
      %c0_19 = arith.constant 0 : index
      %23 = vector.load %arg7[%c0_18, %c0_19] : memref<1x32xf32, #tpu.memory_space<vmem>>, vector<1x32xf32>
      %c0_20 = arith.constant 0 : index
      %c0_21 = arith.constant 0 : index
      %24 = vector.load %arg4[%c0_20, %c0_21] : memref<32x16xf32, #tpu.memory_space<vmem>>, vector<32x16xf32>
      %cst_22 = arith.constant dense<0.000000e+00> : vector<1x16xf32>
      %25 = tpu.matmul %23, %24, %cst_22 {dimension_numbers = #tpu.dot_dimension_numbers<[1], [0], [0], [1], [0, 0, 1, 1], [], []>} : vector<1x32xf32>, vector<32x16xf32>, vector<1x16xf32> -> vector<1x16xf32>
      %26 = arith.addf %22, %25 : vector<1x16xf32>
      %c0_23 = arith.constant 0 : index
      %c0_24 = arith.constant 0 : index
      %27 = vector.load %arg8[%c0_23, %c0_24] : memref<1x16xf32, #tpu.memory_space<vmem>>, vector<1x16xf32>
      tpu.vector_store %arg8[%c0_23, %c0_24], %26 {strides = array<i32>} : memref<1x16xf32, #tpu.memory_space<vmem>>, vector<1x16xf32>,
    } else {
    }
    %c0_i32_13 = arith.constant 0 : i32
    %17 = arith.cmpi eq, %arg0, %c0_i32_13 : i32
    %c0_i32_14 = arith.constant 0 : i32
    %18 = arith.cmpi eq, %arg1, %c0_i32_14 : i32
    %19 = arith.andi %17, %18 : i1
    %20 = arith.extui %19 : i1 to i32
    %c0_i32_15 = arith.constant 0 : i32
    %21 = arith.cmpi ne, %20, %c0_i32_15 : i32
    scf.if %21 {
      %c0_16 = arith.constant 0 : index
      %c0_17 = arith.constant 0 : index
      %22 = vector.load %arg8[%c0_16, %c0_17] : memref<1x16xf32, #tpu.memory_space<vmem>>, vector<1x16xf32>
      %23 = tpu.transpose %22, [1, 0] : vector<1x16xf32> -> vector<16x1xf32>
      %c0_18 = arith.constant 0 : index
      %c0_19 = arith.constant 0 : index
      %24 = vector.load %arg5[%c0_18, %c0_19] : memref<16x16xf32, #tpu.memory_space<vmem>>, vector<16x16xf32>
      %cst_20 = arith.constant dense<0.000000e+00> : vector<16x1xf32>
      %25 = tpu.matmul %24, %23, %cst_20 {dimension_numbers = #tpu.dot_dimension_numbers<[1], [0], [0], [1], [0, 0, 1, 1], [], []>} : vector<16x16xf32>, vector<16x1xf32>, vector<16x1xf32> -> vector<16x1xf32>
      %26 = arith.mulf %25, %23 : vector<16x1xf32>
      %27 = vector.shape_cast %26 : vector<16x1xf32> to vector<1x16x1xf32>
      %cst_21 = arith.constant dense<0.000000e+00> : vector<1xf32>
      %28 = vector.multi_reduction <add>, %27, %cst_21 [1, 2] : vector<1x16x1xf32> to vector<1xf32>
      %29 = vector.shape_cast %28 : vector<1xf32> to vector<1x1x1xf32>
      %30 = vector.extract %29[0, 0, 0] : f32 from vector<1x1x1xf32>
      %31 = vector.broadcast %30 : f32 to vector<1x1xf32>
      %c0_22 = arith.constant 0 : index
      %c0_23 = arith.constant 0 : index
      %32 = vector.load %arg6[%c0_22, %c0_23] : memref<1x1xf32, #tpu.memory_space<vmem>>, vector<1x1xf32>
      tpu.vector_store %arg6[%c0_22, %c0_23], %31 {strides = array<i32>} : memref<1x1xf32, #tpu.memory_space<vmem>>, vector<1x1xf32>,
    } else {
    }
    return
  }
  func.func @transform_0(%arg0: i32, %arg1: i32) -> (i32, i32) {
    %c0_i32 = arith.constant 0 : i32
    %c0_i32_0 = arith.constant 0 : i32
    return %c0_i32, %arg1 : i32, i32
  }
  func.func @transform_1(%arg0: i32, %arg1: i32) -> (i32, i32) {
    %c0_i32 = arith.constant 0 : i32
    return %arg1, %arg0 : i32, i32
  }
  func.func @transform_2(%arg0: i32, %arg1: i32) -> (i32, i32) {
    %c0_i32 = arith.constant 0 : i32
    %c0_i32_0 = arith.constant 0 : i32
    return %arg0, %c0_i32 : i32, i32
  }
  func.func @transform_3(%arg0: i32, %arg1: i32) -> (i32, i32) {
    %c0_i32 = arith.constant 0 : i32
    %c0_i32_0 = arith.constant 0 : i32
    %c0_i32_1 = arith.constant 0 : i32
    return %c0_i32, %c0_i32_0 : i32, i32
  }
  func.func @transform_4(%arg0: i32, %arg1: i32) -> (i32, i32) {
    %c0_i32 = arith.constant 0 : i32
    %c0_i32_0 = arith.constant 0 : i32
    %c0_i32_1 = arith.constant 0 : i32
    return %c0_i32, %c0_i32_0 : i32, i32
  }
}

</mosaic_0001>

<bundles_post_ra>
// kernel: tpu_custom_call.1
= control target key start
LH: loop header
LB: loop body
LE: loop exit
PB: predicated region body
PF: predicated region fallthrough
CT: control target
= control target key end

     0   :  { %vm24_vm0 = vcmask 122880   ;;  %v443_v3 = vmov 0.0|0.0   ;;  %v444_v6 = vmov 0.0   ;;  %vm29_vm1 = vcmask 253952   ;;  %s523_s0 = inlined_call_operand.vmem [shape: f32[1,32], index: 0, kind: input, shape index: {}]   ;;  %s524_s1 = inlined_call_operand.vmem [shape: f32[32,32], index: 1, kind: input, shape index: {}]   ;;  %s525_s2 = inlined_call_operand.vmem [shape: f32[32,16], index: 2, kind: input, shape index: {}]   ;;  %s526_s3 = inlined_call_operand.vmem [shape: f32[16,16], index: 3, kind: input, shape index: {}]   ;;  %s527_s4 = inlined_call_operand.hbm [shape: f32[1,1], index: 4, kind: output, shape index: {}]  }
   0x1   :  { %v33_v0 = vld [vmem:[%s524_s1] sm:$0xff]  ;;  %v34_v1 = vld [vmem:[%s524_s1 + $0x8] sm:$0xff]  ;;  %v35_v2 = vld [vmem:[%s524_s1 + $0x10] sm:$0xff]  ;;  %397 = vmatprep.subr.bf16.mxu0 %v443_v3  ;;  %25 = vst.msk [vmem:[#allocation3] sm:$0x1] %vm24_vm0, %v444_v6  ;;  %403 = vmatprep.subr.bf16.mxu1 %v443_v3  ;;  %vm445_vm2 = vmmov 0  }
   0x2   :  { %v398_v4 = vpack.c.bf16 %v34_v1, %v33_v0  ;;  %v36_v5 = vld [vmem:[%s524_s1 + $0x18] sm:$0xff]  ;;  %30 = vst.msk [vmem:[#allocation2] sm:$0x1] %vm29_vm1, %v444_v6  ;;  %376 = vmatprep.mubr.msk.f32.mxu0 %vm445_vm2, %v444_v6  ;;  %387 = vmatprep.mubr.msk.f32.mxu1 %vm445_vm2, %v444_v6 }
   0x3   :  { %9 = vsyncpa [#allocation5], 0  ;;  %v401_v7 = vpack.c.bf16 %v36_v5, %v35_v2  ;;  %v32_v8 = vld [vmem:[%s523_s0] sm:$0x1]  ;;  %vm37_vm3 = vcmask 261120   ;;  %v120_v10 = vld [vmem:[%s525_s2 + $0x8] sm:$0xff] }
   0x4   :  { %399 = vmatpush3.bf16.msra.mxu0 %v398_v4  ;;  %v119_v9 = vld [vmem:[%s525_s2] sm:$0xff]  ;;  %v121_v12 = vld [vmem:[%s525_s2 + $0x10] sm:$0xff]  ;;  %v122_v13 = vld [vmem:[%s525_s2 + $0x18] sm:$0xff]  ;;  %vm236_vm4 = vcmask 130048   ;;  %vm320_vm5 = vcmask 7168   ;;  %s446_s8 = smov [#allocation4]  }
   0x5   :  { %400 = vmatprep.subr.bf16.mxu0 %v443_v3  ;;  %v404_v11 = vpack.c.bf16 %v120_v10, %v119_v9  ;;  %v407_v14 = vpack.c.bf16 %v122_v13, %v121_v12  ;;  %v234_v25 = vld [vmem:[%s526_s3] sm:$0xff]  ;;  %v235_v29 = vld [vmem:[%s526_s3 + $0x8] sm:$0xff]  ;;  %s342_s3 = sshll.u32 %s446_s8, 4  ;;  %vm334_vm6 = vcmask 0   ;;  %s343_s3 = int_to_ptr.vmem [resolvable:$true] %s342_s3 }
   0x6   :  { %s419_s10 = scalar_lea.vmem %s343_s3, 16  ;;  %s423_s11 = scalar_lea.vmem %s343_s3, 32 }
   0x7   :  { %405 = vmatpush3.bf16.msra.mxu1 %v404_v11  ;;  %p420_p0 = scmp.ne.s32.totalorder %s343_s3, %s419_s10  ;;  %p424_p1 = scmp.lt.s32.totalorder %s343_s3, %s343_s3 }
   0x8   :  { %402 = vmatpush3.bf16.msra.mxu0 %v401_v7  ;;  %406 = vmatprep.subr.bf16.mxu1 %v443_v3  ;;  %v117_v20 = vld [vmem:[#allocation3] sm:$0x1]  ;;  %p425_p2 = scmp.lt.s32.totalorder %s423_s11, %s419_s10 }
   0x9   :  { %v31_v15 = vld [vmem:[#allocation2] sm:$0x1] }
   0xa   :  { %p426_p3 = por %p425_p2, %p424_p1 }
   0xb   :  { %377 = vmatmul.mubr.msk.f32.vlgmr.msra.gmra.mrb[0].mxu0 %vm37_vm3, %v32_v8  ;;  %408 = vmatpush3.bf16.msra.mxu1 %v407_v14 }
   0xc   :  { %394 = vmatprep.mubr.msk.f32.mxu0 %vm236_vm4, %v234_v25  ;;  %p427_p4 = pnand %p426_p3, %p420_p0 }
  0xde   :  { %v107_v16 = vpop.f32.mrb[0].mxu0 }
  0xdf   :  { %v111_v17 = vadd.f32 %v107_v16, %v31_v15  ;;  %v378_v18 = vpop.f32.mrb[1].mxu0 }
  0xe1   :  { %113 = vst.msk [vmem:[#allocation2] sm:$0x1] %vm29_vm1, %v111_v17 }
  0xe8   :  { %v118_v19 = vld [vmem:[#allocation2] sm:$0x1] }
  0xe9   :  { %388 = vmatmul.mubr.msk.f32.vlgmr.msra.gmra.mrb[0].mxu1 %vm37_vm3, %v118_v19 }
 0x1bc   :  { %v192_v21 = vpop.f32.mrb[0].mxu1 }
 0x1bd   :  { %v196_v22 = vadd.f32 %v192_v21, %v117_v20  ;;  %v389_v23 = vpop.f32.mrb[1].mxu1 }
 0x1bf   :  { %198 = vst.msk [vmem:[#allocation3] sm:$0x1] %vm24_vm0, %v196_v22 }
 0x1c6   :  { %v201_v24 = vld [vmem:[#allocation3] sm:$0x1] }
 0x1c7   :  { %202 = vxpose.xlu0.b32.start.end [1/1] (short) (narrow) %v201_v24, 16 }
 0x247   :  { %v218_v26 = vpop.trf.xlu0 }
 0x24b   :  { %v219_v27 = vpop.trf.xlu0 }
 0x24c   :  { %v409_v28 = vpack.c.bf16 %v219_v27, %v218_v26 }
 0x24e   :  { %410 = vmatprep.subr.bf16.mxu0 %v409_v28 }
 0x24f   :  { %412 = vmatpush3.bf16.msra.mxu0 %v409_v28 }
 0x252   :  { %395 = vmatmul.mubr.msk.f32.vlgmr.msra.gmra.mrb[2].mxu0 %vm236_vm4, %v235_v29 }
 0x325   :  { %v396_v30 = vpop.f32.mrb[2].mxu0 }
 0x326   :  { %v319_v31 = vmul.f32 %v396_v30, %v219_v27  ;;  %v309_v32 = vpop.f32.mrb[3].mxu0 }
 0x327   :  { %v318_v33 = vmul.f32 %v309_v32, %v218_v26 }
 0x328   :  { %v322_v34 = vsel %vm320_vm5, %v319_v31, 0.0 }
 0x329   :  { %v321_v35 = vsel %vm320_vm5, %v318_v33, 0.0 }
 0x32a   :  { %v323_v36 = vadd.f32 %v322_v34, %v321_v35 }
 0x32c   :  { %324 = vadd.xlane.f32.xlu0 %v323_v36 }
 0x3b9   :  { %v325_v37 = vpop.xlane.xlu0 %324 }
 0x3ba   :  { %v326_v38 = vrot.slane %v325_v37, 4 }
 0x3bc   :  { %v327_v39 = vadd.f32 %v326_v38, %v325_v37 }
 0x3be   :  { %v328_v40 = vrot.slane %v327_v39, 2 }
 0x3c0   :  { %v329_v41 = vadd.f32 %v328_v40, %v327_v39 }
 0x3c2   :  { %v330_v42 = vrot.slane %v329_v41, 1 }
 0x3c4   :  { %v331_v43 = vadd.f32 %v330_v42, %v329_v41 }
 0x3c6   :  { %413 = vpush %v331_v43 }
 0x3f7   :  { %s414_s9 = spop %413 }
 0x3f8   :  { %v333_v44 = vstv %s414_s9 }
 0x3f9   :  { %335 = vst.msk [vmem:[#allocation4] sm:$0x1] %vm334_vm6, %v333_v44 }
 0x3fa   :  { %430 = shalt.err (!%p427_p4)
}
 0x3fb   :  { %s431_s14 = scalar_lea.hbm %s527_s4, 16 }
 0x3fc   :  { %p432_p5 = scmp.ne.s32.totalorder %s527_s4, %s431_s14  ;;  %p435_p6 = scmp.lt.u32.totalorder %s431_s14, %s527_s4 }
 0x3fe   :  { %p437_p7 = pnand %p435_p6, %p432_p5 }
 0x400   :  { %440 = shalt.err (!%p437_p7)
}
 0x401   :  { %345 = dma.vmem_to_hbm [thread:$0]  %s343_s3, 16, %s527_s4, [#allocation5]  }
 0x402   :  { %441 = dma.done.wait [#allocation5], 16  }
 0x403   :  { %442 = vsyncadd [#allocation5], 4294967280 }
 0x404   :  { %349 = vsyncpa [#allocation5], 1 }

</bundles_post_ra>
